<compile_context>
chip_gen: v6e
topology: v6e:2x2x1
jax: 0.10.0
libtpu: 0.0.40
codegen_flags: <defaults>
</compile_context>

<pallas_src>
import jax
import jax.numpy as jnp
from jax.experimental import pallas as pl
from jax.experimental.pallas import tpu as pltpu


def _round_up(x, m):
    return ((x + m - 1) // m) * m


def _tensorcores_per_chip():
    """TensorCores addressable by a 'parallel' grid axis on one chip."""
    try:
        kind = jax.devices()[0].device_kind.lower()
    except Exception:
        return 1
    if "v7" in kind:                     # v7x: 2 TCs per chip
        return 2
    if "v4" in kind or "v5p" in kind:    # megacore chips
        return 2
    return 1                             # v5e / v6e: single TC


def dqn_forward_kernel(x_ref, w1_ref, b1_ref, w3_ref, b3_ref, out_ref):
    # fc1 + ReLU: f32 MXU matmul, f32 VPU epilogue. Hidden dim is pre-padded
    # to a lane-dense 128, so h1 fills vregs and fc3's contraction K is 128.
    h1 = jnp.dot(x_ref[...], w1_ref[...], preferred_element_type=jnp.float32)
    h1 = jnp.maximum(h1 + b1_ref[...], 0.0)
    # fc3 (no activation), stored at the true n_actions width (no padded slab).
    out_ref[...] = (jnp.dot(h1, w3_ref[...], preferred_element_type=jnp.float32)
                    + b3_ref[...])


def prepare_params(params):
    """One-time parameter prep, hoisted out of the per-call path: keeps the
    transposed (in, out) weights and zero-pads the fc1 hidden dim up to a
    multiple of 128 lanes. Padded hidden units see ReLU(0 + 0) = 0 and their
    w3 rows are zero, so the Q-values are bit-for-bit unchanged. fc2 is dead
    code in the original forward and is dropped here."""
    w1, b1 = params["w1"], params["b1"]
    w3, b3 = params["w3"], params["b3"]
    d_in, fc1 = w1.shape
    n_actions = w3.shape[1]
    h_pad = _round_up(fc1, 128)
    if h_pad != fc1:
        w1 = jnp.zeros((d_in, h_pad), w1.dtype).at[:, :fc1].set(w1)
        b1 = jnp.zeros((1, h_pad), b1.dtype).at[:, :fc1].set(b1)
        w3 = jnp.zeros((h_pad, n_actions), w3.dtype).at[:fc1, :].set(w3)
    return {"w1": w1, "b1": b1, "w3": w3, "b3": b3}


def dqn_forward(state, prepared, *, max_block_b=1024):
    """state: (B, input_dim) f32. prepared: output of prepare_params().
    Returns (B, n_actions) f32 Q-values == fc3(relu(fc1(state)))."""
    w1, b1 = prepared["w1"], prepared["b1"]
    w3, b3 = prepared["w3"], prepared["b3"]
    B, d_in = state.shape
    h_pad = w1.shape[1]
    n_actions = w3.shape[1]

    # Grid: exactly one tile per TensorCore (v5e/v6e -> 1 step, v7x -> 2
    # balanced 'parallel' steps), capped so very large batches still pipeline.
    num_tc = _tensorcores_per_chip()
    tb = min(_round_up(pl.cdiv(B, num_tc), 8), max_block_b)
    grid = (pl.cdiv(B, tb),)

    flops = 2 * B * (d_in * h_pad + h_pad * n_actions)
    bytes_accessed = 4 * (state.size + w1.size + b1.size + w3.size + b3.size
                          + B * n_actions)

    return pl.pallas_call(
        dqn_forward_kernel,
        out_shape=jax.ShapeDtypeStruct((B, n_actions), jnp.float32),
        grid=grid,
        in_specs=[
            pl.BlockSpec((tb, d_in), lambda i: (i, 0)),   # state tile (ragged last block OK)
            pl.BlockSpec(w1.shape, lambda i: (0, 0)),     # weights: VMEM-resident
            pl.BlockSpec(b1.shape, lambda i: (0, 0)),
            pl.BlockSpec(w3.shape, lambda i: (0, 0)),
            pl.BlockSpec(b3.shape, lambda i: (0, 0)),
        ],
        out_specs=pl.BlockSpec((tb, n_actions), lambda i: (i, 0)),
        compiler_params=pltpu.CompilerParams(
            dimension_semantics=("parallel",)),           # splits batch across TCs on v7x
        cost_estimate=pl.CostEstimate(flops=flops, transcendentals=0,
                                      bytes_accessed=bytes_accessed),
    )(state, w1, b1, w3, b3)


def init_params(key, input_dim, fc1_dims, fc2_dims, n_actions):
    """Deterministic init mimicking nn.Linear default (uniform +-1/sqrt(fan_in)).
    Weights stored transposed: (in_features, out_features). fc2 is kept for
    module fidelity but its output is discarded in the original forward."""
    def linear(k, fan_in, fan_out):
        kw, kb = jax.random.split(k)
        bound = 1.0 / (fan_in ** 0.5)
        w = jax.random.uniform(kw, (fan_in, fan_out), jnp.float32, -bound, bound)
        b = jax.random.uniform(kb, (1, fan_out), jnp.float32, -bound, bound)
        return w, b

    k1, k2, k3 = jax.random.split(key, 3)
    w1, b1 = linear(k1, input_dim, fc1_dims)
    w2, b2 = linear(k2, fc1_dims, fc2_dims)
    w3, b3 = linear(k3, fc2_dims, n_actions)
    return {"w1": w1, "b1": b1, "w2": w2, "b2": b2, "w3": w3, "b3": b3}


if __name__ == "__main__":
    # Shapes consistent with DeepQNetwork(lr, input_dims=(16,), 32, 32, 8).
    # (fc1_dims == fc2_dims is required for the original forward to even run.)
    B, INPUT_DIM, FC1, FC2, N_ACTIONS = 256, 16, 32, 32, 8

    key = jax.random.PRNGKey(0)
    k_params, k_state = jax.random.split(key)
    params = init_params(k_params, INPUT_DIM, FC1, FC2, N_ACTIONS)
    prepared = prepare_params(params)            # one-time, hoisted out of the call
    state = jax.random.normal(k_state, (B, INPUT_DIM), jnp.float32)

    actions = dqn_forward(state, prepared)
    jax.block_until_ready(actions)
    assert actions.shape == (B, N_ACTIONS)

    # Reference: full-f32 math (== the PyTorch module's forward).
    h1_ref = jnp.maximum(
        jnp.dot(state, params["w1"], precision=jax.lax.Precision.HIGHEST)
        + params["b1"], 0.0)
    ref = (jnp.dot(h1_ref, params["w3"], precision=jax.lax.Precision.HIGHEST)
           + params["b3"])
    assert jnp.allclose(actions, ref, atol=1e-3, rtol=1e-3), \
        float(jnp.max(jnp.abs(actions - ref)))

    print("KERNEL_OK")
</pallas_src>

<mosaic_0001>
module attributes {stable_mosaic.version = 11 : i64} {
  func.func @dqn_forward_kernel(%arg0: i32, %arg1: memref<256x16xf32, #tpu.memory_space<vmem>>, %arg2: memref<16x128xf32, #tpu.memory_space<vmem>>, %arg3: memref<1x128xf32, #tpu.memory_space<vmem>>, %arg4: memref<128x8xf32, #tpu.memory_space<vmem>>, %arg5: memref<1x8xf32, #tpu.memory_space<vmem>>, %arg6: memref<256x8xf32, #tpu.memory_space<vmem>>) attributes {dimension_semantics = [#tpu.dimension_semantics<parallel>], iteration_bounds = array<i64: 1>, scalar_prefetch = 0 : i64, scratch_operands = 0 : i64, tpu.core_type = #tpu.core_type<tc>, window_params = [{transform_indices = @transform_0, window_bounds = array<i64: 256, 16>}, {pipeline_mode = #tpu.pipeline_mode<synchronous>, transform_indices = @transform_1, window_bounds = array<i64: 16, 128>}, {pipeline_mode = #tpu.pipeline_mode<synchronous>, transform_indices = @transform_2, window_bounds = array<i64: 1, 128>}, {pipeline_mode = #tpu.pipeline_mode<synchronous>, transform_indices = @transform_3, window_bounds = array<i64: 128, 8>}, {pipeline_mode = #tpu.pipeline_mode<synchronous>, transform_indices = @transform_4, window_bounds = array<i64: 1, 8>}, {transform_indices = @transform_5, window_bounds = array<i64: 256, 8>}]} {
    %c0 = arith.constant 0 : index
    %c0_0 = arith.constant 0 : index
    %0 = vector.load %arg1[%c0, %c0_0] : memref<256x16xf32, #tpu.memory_space<vmem>>, vector<256x16xf32>
    %c0_1 = arith.constant 0 : index
    %c0_2 = arith.constant 0 : index
    %1 = vector.load %arg2[%c0_1, %c0_2] : memref<16x128xf32, #tpu.memory_space<vmem>>, vector<16x128xf32>
    %cst = arith.constant dense<0.000000e+00> : vector<256x128xf32>
    %2 = tpu.matmul %0, %1, %cst {dimension_numbers = #tpu.dot_dimension_numbers<[1], [0], [0], [1], [0, 0, 1, 1], [], []>} : vector<256x16xf32>, vector<16x128xf32>, vector<256x128xf32> -> vector<256x128xf32>
    %c0_3 = arith.constant 0 : index
    %c0_4 = arith.constant 0 : index
    %3 = vector.load %arg3[%c0_3, %c0_4] : memref<1x128xf32, #tpu.memory_space<vmem>>, vector<1x128xf32>
    %4 = vector.broadcast %3 : vector<1x128xf32> to vector<256x128xf32>
    %5 = arith.addf %2, %4 : vector<256x128xf32>
    %cst_5 = arith.constant 0.000000e+00 : f32
    %6 = vector.broadcast %cst_5 : f32 to vector<256x128xf32>
    %7 = arith.maximumf %5, %6 : vector<256x128xf32>
    %c0_6 = arith.constant 0 : index
    %c0_7 = arith.constant 0 : index
    %8 = vector.load %arg4[%c0_6, %c0_7] : memref<128x8xf32, #tpu.memory_space<vmem>>, vector<128x8xf32>
    %cst_8 = arith.constant dense<0.000000e+00> : vector<256x8xf32>
    %9 = tpu.matmul %7, %8, %cst_8 {dimension_numbers = #tpu.dot_dimension_numbers<[1], [0], [0], [1], [0, 0, 1, 1], [], []>} : vector<256x128xf32>, vector<128x8xf32>, vector<256x8xf32> -> vector<256x8xf32>
    %c0_9 = arith.constant 0 : index
    %c0_10 = arith.constant 0 : index
    %10 = vector.load %arg5[%c0_9, %c0_10] : memref<1x8xf32, #tpu.memory_space<vmem>>, vector<1x8xf32>
    %11 = vector.broadcast %10 : vector<1x8xf32> to vector<256x8xf32>
    %12 = arith.addf %9, %11 : vector<256x8xf32>
    %c0_11 = arith.constant 0 : index
    %c0_12 = arith.constant 0 : index
    %13 = vector.load %arg6[%c0_11, %c0_12] : memref<256x8xf32, #tpu.memory_space<vmem>>, vector<256x8xf32>
    tpu.vector_store %arg6[%c0_11, %c0_12], %12 {strides = array<i32>} : memref<256x8xf32, #tpu.memory_space<vmem>>, vector<256x8xf32>,
    return
  }
  func.func @transform_0(%arg0: i32) -> (i32, i32) {
    %c0_i32 = arith.constant 0 : i32
    %c0_i32_0 = arith.constant 0 : i32
    return %arg0, %c0_i32 : i32, i32
  }
  func.func @transform_1(%arg0: i32) -> (i32, i32) {
    %c0_i32 = arith.constant 0 : i32
    %c0_i32_0 = arith.constant 0 : i32
    %c0_i32_1 = arith.constant 0 : i32
    return %c0_i32, %c0_i32_0 : i32, i32
  }
  func.func @transform_2(%arg0: i32) -> (i32, i32) {
    %c0_i32 = arith.constant 0 : i32
    %c0_i32_0 = arith.constant 0 : i32
    %c0_i32_1 = arith.constant 0 : i32
    return %c0_i32, %c0_i32_0 : i32, i32
  }
  func.func @transform_3(%arg0: i32) -> (i32, i32) {
    %c0_i32 = arith.constant 0 : i32
    %c0_i32_0 = arith.constant 0 : i32
    %c0_i32_1 = arith.constant 0 : i32
    return %c0_i32, %c0_i32_0 : i32, i32
  }
  func.func @transform_4(%arg0: i32) -> (i32, i32) {
    %c0_i32 = arith.constant 0 : i32
    %c0_i32_0 = arith.constant 0 : i32
    %c0_i32_1 = arith.constant 0 : i32
    return %c0_i32, %c0_i32_0 : i32, i32
  }
  func.func @transform_5(%arg0: i32) -> (i32, i32) {
    %c0_i32 = arith.constant 0 : i32
    %c0_i32_0 = arith.constant 0 : i32
    return %arg0, %c0_i32 : i32, i32
  }
}

</mosaic_0001>

<bundles_post_ra>
// kernel: tpu_custom_call.1
= control target key start
LH: loop header
LB: loop body
LE: loop exit
PB: predicated region body
PF: predicated region fallthrough
CT: control target
= control target key end

     0   :  { %vm61_vm0 = vcmask 130048   ;;  %vm663_vm1 = vcmask 64512   ;;  %s1394_s1 = inlined_call_operand.vmem [shape: f32[16,128], index: 1, kind: input, shape index: {}]   ;;  %s1395_s0 = inlined_call_operand.vmem [shape: f32[256,16], index: 0, kind: input, shape index: {}]   ;;  %s1396_s3 = inlined_call_operand.vmem [shape: f32[128,8], index: 3, kind: input, shape index: {}]   ;;  %s1397_s2 = inlined_call_operand.vmem [shape: f32[1,128], index: 2, kind: input, shape index: {}]   ;;  %s1398_s4 = inlined_call_operand.vmem [shape: f32[1,8], index: 4, kind: input, shape index: {}]   ;;  %s1399_s5 = inlined_call_operand.vmem [shape: f32[256,8], index: 5, kind: output, shape index: {}]  }
   0x1   :  { %v53_v0 = vld [vmem:[%s1394_s1 + $0x8] sm:$0xff]  ;;  %v52_v1 = vld [vmem:[%s1394_s1] sm:$0xff]  ;;  %v22_v4 = vld [vmem:[%s1395_s0 + $0x10] sm:$0xff] }
   0x2   :  { %v20_v2 = vld [vmem:[%s1395_s0] sm:$0xff]  ;;  %816 = vmatprep.subr.mxu0 %v53_v0  ;;  %v21_v3 = vld [vmem:[%s1395_s0 + $0x8] sm:$0xff]  ;;  %v23_v5 = vld [vmem:[%s1395_s0 + $0x18] sm:$0xff] }
   0x3   :  { %820 = vmatprep.mubr.msk.f32.mxu0 %vm61_vm0, %v20_v2  ;;  %817 = vmatpush3.msra.mxu0 %v53_v0  ;;  %v24_v6 = vld [vmem:[%s1395_s0 + $0x20] sm:$0xff]  ;;  %v25_v7 = vld [vmem:[%s1395_s0 + $0x28] sm:$0xff]  ;;  %v26_v8 = vld [vmem:[%s1395_s0 + $0x30] sm:$0xff] }
   0x4   :  { %818 = vmatprep.subr.mxu0 %v52_v1  ;;  %v430_v9 = vld [vmem:[%s1396_s3 + $0x78] sm:$0xff]  ;;  %v429_v10 = vld [vmem:[%s1396_s3 + $0x70] sm:$0xff]  ;;  %v428_v12 = vld [vmem:[%s1396_s3 + $0x68] sm:$0xff] }
   0x5   :  { %819 = vmatpush3.msra.mxu0 %v52_v1  ;;  %948 = vmatprep.subr.mxu1 %v430_v9  ;;  %v27_v11 = vld [vmem:[%s1395_s0 + $0x38] sm:$0xff]  ;;  %v28_v13 = vld [vmem:[%s1395_s0 + $0x40] sm:$0xff]  ;;  %v29_v15 = vld [vmem:[%s1395_s0 + $0x48] sm:$0xff] }
   0x6   :  { %821 = vmatmul.mubr.msk.f32.vlgmr.msra.gmra.mxu0 %vm61_vm0, %v21_v3  ;;  %868 = vmatprep.subr.mxu0 %v430_v9  ;;  %v427_v14 = vld [vmem:[%s1396_s3 + $0x60] sm:$0xff]  ;;  %v426_v16 = vld [vmem:[%s1396_s3 + $0x58] sm:$0xff]  ;;  %v30_v17 = vld [vmem:[%s1395_s0 + $0x50] sm:$0xff] }
   0x7   :  { %823 = vmatprep.mubr.msk.f32.mxu0 %vm61_vm0, %v22_v4  ;;  %964 = vmatpush3.msra.mxu1 %v430_v9  ;;  %v425_v18 = vld [vmem:[%s1396_s3 + $0x50] sm:$0xff]  ;;  %v31_v19 = vld [vmem:[%s1395_s0 + $0x58] sm:$0xff]  ;;  %v424_v20 = vld [vmem:[%s1396_s3 + $0x48] sm:$0xff] }
   0x8   :  { %869 = vmatpush3.msra.mxu0 %v430_v9  ;;  %949 = vmatprep.subr.mxu1 %v429_v10  ;;  %v32_v21 = vld [vmem:[%s1395_s0 + $0x60] sm:$0xff]  ;;  %v33_v23 = vld [vmem:[%s1395_s0 + $0x68] sm:$0xff]  ;;  %v422_v24 = vld [vmem:[%s1396_s3 + $0x38] sm:$0xff] }
   0x9   :  { %870 = vmatprep.subr.mxu0 %v429_v10  ;;  %965 = vmatpush3.msra.mxu1 %v429_v10  ;;  %v423_v22 = vld [vmem:[%s1396_s3 + $0x40] sm:$0xff]  ;;  %v34_v25 = vld [vmem:[%s1395_s0 + $0x70] sm:$0xff]  ;;  %v35_v27 = vld [vmem:[%s1395_s0 + $0x78] sm:$0xff] }
   0xa   :  { %824 = vmatmul.mubr.msk.f32.gmra.mxu0 %vm61_vm0, %v23_v5  ;;  %950 = vmatprep.subr.mxu1 %v428_v12  ;;  %v421_v26 = vld [vmem:[%s1396_s3 + $0x30] sm:$0xff]  ;;  %v420_v28 = vld [vmem:[%s1396_s3 + $0x28] sm:$0xff]  ;;  %v36_v29 = vld [vmem:[%s1395_s0 + $0x80] sm:$0xff] }
   0xb   :  { %826 = vmatprep.mubr.msk.f32.mxu0 %vm61_vm0, %v24_v6  ;;  %871 = vmatpush3.msra.mxu0 %v429_v10  ;;  %v419_v30 = vld [vmem:[%s1396_s3 + $0x20] sm:$0xff]  ;;  %v37_v31 = vld [vmem:[%s1395_s0 + $0x88] sm:$0xff]  ;;  %v38_v32 = vld [vmem:[%s1395_s0 + $0x90] sm:$0xff] }
   0xc   :  { %872 = vmatprep.subr.mxu0 %v428_v12  ;;  %966 = vmatpush3.msra.mxu1 %v428_v12  ;;  %v39_v33 = vld [vmem:[%s1395_s0 + $0x98] sm:$0xff]  ;;  %v40_v34 = vld [vmem:[%s1395_s0 + $0xa0] sm:$0xff]  ;;  %v41_v35 = vld [vmem:[%s1395_s0 + $0xa8] sm:$0xff] }
   0xd   :  { %873 = vmatpush3.msra.mxu0 %v428_v12  ;;  %951 = vmatprep.subr.mxu1 %v427_v14  ;;  %v42_v36 = vld [vmem:[%s1395_s0 + $0xb0] sm:$0xff]  ;;  %v43_v37 = vld [vmem:[%s1395_s0 + $0xb8] sm:$0xff]  ;;  %v44_v38 = vld [vmem:[%s1395_s0 + $0xc0] sm:$0xff] }
   0xe   :  { %827 = vmatmul.mubr.msk.f32.gmra.mxu0 %vm61_vm0, %v25_v7  ;;  %874 = vmatprep.subr.mxu0 %v427_v14  ;;  %v45_v39 = vld [vmem:[%s1395_s0 + $0xc8] sm:$0xff]  ;;  %v46_v40 = vld [vmem:[%s1395_s0 + $0xd0] sm:$0xff]  ;;  %v47_v41 = vld [vmem:[%s1395_s0 + $0xd8] sm:$0xff] }
   0xf   :  { %829 = vmatprep.mubr.msk.f32.mxu0 %vm61_vm0, %v26_v8  ;;  %875 = vmatpush3.msra.mxu0 %v427_v14  ;;  %v48_v42 = vld [vmem:[%s1395_s0 + $0xe0] sm:$0xff]  ;;  %v49_v43 = vld [vmem:[%s1395_s0 + $0xe8] sm:$0xff]  ;;  %v50_v44 = vld [vmem:[%s1395_s0 + $0xf0] sm:$0xff] }
  0x10   :  { %876 = vmatprep.subr.mxu0 %v426_v16  ;;  %967 = vmatpush3.msra.mxu1 %v427_v14  ;;  %v51_v45 = vld [vmem:[%s1395_s0 + $0xf8] sm:$0xff]  ;;  %v417_v47 = vld [vmem:[%s1396_s3 + $0x10] sm:$0xff]  ;;  %v416_v48 = vld [vmem:[%s1396_s3 + $0x8] sm:$0xff] }
  0x11   :  { %877 = vmatpush3.msra.mxu0 %v426_v16  ;;  %952 = vmatprep.subr.mxu1 %v426_v16  ;;  %v418_v46 = vld [vmem:[%s1396_s3 + $0x18] sm:$0xff]  ;;  %v415_v49 = vld [vmem:[%s1396_s3] sm:$0xff] }
  0x12   :  { %830 = vmatmul.mubr.msk.f32.gmra.mxu0 %vm61_vm0, %v27_v11  ;;  %878 = vmatprep.subr.mxu0 %v425_v18  ;;  %v1195_v50 = vld [vmem:[%s1397_s2] ss:$0 sm:$0xff] }
  0x13   :  { %832 = vmatprep.mubr.msk.f32.mxu0 %vm61_vm0, %v28_v13  ;;  %879 = vmatpush3.msra.mxu0 %v425_v18 }
  0x14   :  { %880 = vmatprep.subr.mxu0 %v424_v20  ;;  %968 = vmatpush3.msra.mxu1 %v426_v16 }
  0x15   :  { %881 = vmatpush3.msra.mxu0 %v424_v20  ;;  %953 = vmatprep.subr.mxu1 %v425_v18 }
  0x16   :  { %833 = vmatmul.mubr.msk.f32.gmra.mxu0 %vm61_vm0, %v29_v15  ;;  %882 = vmatprep.subr.mxu0 %v423_v22 }
  0x17   :  { %835 = vmatprep.mubr.msk.f32.mxu0 %vm61_vm0, %v30_v17  ;;  %883 = vmatpush3.msra.mxu0 %v423_v22 }
  0x18   :  { %884 = vmatprep.subr.mxu0 %v422_v24  ;;  %969 = vmatpush3.msra.mxu1 %v425_v18 }
  0x19   :  { %885 = vmatpush3.msra.mxu0 %v422_v24  ;;  %954 = vmatprep.subr.mxu1 %v424_v20 }
  0x1a   :  { %836 = vmatmul.mubr.msk.f32.gmra.mxu0 %vm61_vm0, %v31_v19  ;;  %886 = vmatprep.subr.mxu0 %v421_v26 }
  0x1b   :  { %838 = vmatprep.mubr.msk.f32.mxu0 %vm61_vm0, %v32_v21  ;;  %887 = vmatpush3.msra.mxu0 %v421_v26 }
  0x1c   :  { %888 = vmatprep.subr.mxu0 %v420_v28  ;;  %970 = vmatpush3.msra.mxu1 %v424_v20 }
  0x1d   :  { %889 = vmatpush3.msra.mxu0 %v420_v28  ;;  %955 = vmatprep.subr.mxu1 %v423_v22 }
  0x1e   :  { %839 = vmatmul.mubr.msk.f32.gmra.mxu0 %vm61_vm0, %v33_v23  ;;  %890 = vmatprep.subr.mxu0 %v419_v30 }
  0x1f   :  { %841 = vmatprep.mubr.msk.f32.mxu0 %vm61_vm0, %v34_v25  ;;  %891 = vmatpush3.msra.mxu0 %v419_v30 }
  0x20   :  { %971 = vmatpush3.msra.mxu1 %v423_v22  ;;  %892 = vmatprep.subr.mxu0 %v418_v46 }
  0x21   :  { %956 = vmatprep.subr.mxu1 %v422_v24  ;;  %893 = vmatpush3.msra.mxu0 %v418_v46 }
  0x22   :  { %842 = vmatmul.mubr.msk.f32.gmra.mxu0 %vm61_vm0, %v35_v27  ;;  %972 = vmatpush3.msra.mxu1 %v422_v24 }
  0x23   :  { %844 = vmatprep.mubr.msk.f32.mxu0 %vm61_vm0, %v36_v29  ;;  %957 = vmatprep.subr.mxu1 %v421_v26 }
  0x24   :  { %973 = vmatpush3.msra.mxu1 %v421_v26  ;;  %894 = vmatprep.subr.mxu0 %v417_v47 }
  0x25   :  { %958 = vmatprep.subr.mxu1 %v420_v28  ;;  %895 = vmatpush3.msra.mxu0 %v417_v47 }
  0x26   :  { %845 = vmatmul.mubr.msk.f32.gmra.mxu0 %vm61_vm0, %v37_v31  ;;  %974 = vmatpush3.msra.mxu1 %v420_v28 }
  0x27   :  { %847 = vmatprep.mubr.msk.f32.mxu0 %vm61_vm0, %v38_v32  ;;  %959 = vmatprep.subr.mxu1 %v419_v30 }
  0x28   :  { %975 = vmatpush3.msra.mxu1 %v419_v30  ;;  %896 = vmatprep.subr.mxu0 %v416_v48 }
  0x29   :  { %960 = vmatprep.subr.mxu1 %v418_v46  ;;  %897 = vmatpush3.msra.mxu0 %v416_v48 }
  0x2a   :  { %848 = vmatmul.mubr.msk.f32.gmra.mxu0 %vm61_vm0, %v39_v33  ;;  %976 = vmatpush3.msra.mxu1 %v418_v46 }
  0x2b   :  { %850 = vmatprep.mubr.msk.f32.mxu0 %vm61_vm0, %v40_v34  ;;  %961 = vmatprep.subr.mxu1 %v417_v47 }
  0x2c   :  { %977 = vmatpush3.msra.mxu1 %v417_v47  ;;  %898 = vmatprep.subr.mxu0 %v415_v49 }
  0x2d   :  { %962 = vmatprep.subr.mxu1 %v416_v48  ;;  %899 = vmatpush3.msra.mxu0 %v415_v49 }
  0x2e   :  { %851 = vmatmul.mubr.msk.f32.gmra.mxu0 %vm61_vm0, %v41_v35  ;;  %978 = vmatpush3.msra.mxu1 %v416_v48 }
  0x2f   :  { %853 = vmatprep.mubr.msk.f32.mxu0 %vm61_vm0, %v42_v36  ;;  %963 = vmatprep.subr.mxu1 %v415_v49 }
  0x30   :  { %979 = vmatpush3.msra.mxu1 %v415_v49 }
  0x32   :  { %854 = vmatmul.mubr.msk.f32.gmra.mxu0 %vm61_vm0, %v43_v37 }
  0x33   :  { %856 = vmatprep.mubr.msk.f32.mxu0 %vm61_vm0, %v44_v38 }
  0x36   :  { %857 = vmatmul.mubr.msk.f32.gmra.mxu0 %vm61_vm0, %v45_v39 }
  0x37   :  { %859 = vmatprep.mubr.msk.f32.mxu0 %vm61_vm0, %v46_v40 }
  0x3a   :  { %860 = vmatmul.mubr.msk.f32.gmra.mxu0 %vm61_vm0, %v47_v41 }
  0x3b   :  { %862 = vmatprep.mubr.msk.f32.mxu0 %vm61_vm0, %v48_v42 }
  0x3e   :  { %863 = vmatmul.mubr.msk.f32.gmra.mxu0 %vm61_vm0, %v49_v43 }
  0x3f   :  { %865 = vmatprep.mubr.msk.f32.mxu0 %vm61_vm0, %v50_v44 }
  0x42   :  { %866 = vmatmul.mubr.msk.f32.gmra.mxu0 %vm61_vm0, %v51_v45 }
  0xc6   :  { %v822_v51 = vpop.f32.mrf.mxu0 }
  0xc7   :  { %v230_v52 = vadd.f32 %v822_v51, %v1195_v50 }
  0xc8   :  { %v224_v53 = vpop.f32.mrf.mxu0 }
  0xc9   :  { %v225_v54 = vadd.f32 %v1195_v50, %v224_v53  ;;  %v384_v57 = vmax.f32 %v230_v52, 0.0 }
  0xca   :  { %v825_v55 = vpop.f32.mrf.mxu0 }
  0xcb   :  { %v383_v56 = vmax.f32 %v225_v54, 0.0  ;;  %v240_v58 = vadd.f32 %v825_v55, %v1195_v50 }
  0xcc   :  { %v234_v59 = vpop.f32.mrf.mxu0 }
  0xcd   :  { %v235_v60 = vadd.f32 %v1195_v50, %v234_v59  ;;  %900 = vmatprep.mubr.f32.mxu0 %v383_v56  ;;  %v386_v63 = vmax.f32 %v240_v58, 0.0 }
  0xce   :  { %v828_v61 = vpop.f32.mrf.mxu0  ;;  %901 = vmatmul.mubr.f32.vlgmr.msra.gmra.mxu0 %v384_v57 }
  0xcf   :  { %v385_v62 = vmax.f32 %v235_v60, 0.0  ;;  %v250_v0 = vadd.f32 %v828_v61, %v1195_v50 }
  0xd0   :  { %v244_v1 = vpop.f32.mrf.mxu0 }
  0xd1   :  { %v245_v2 = vadd.f32 %v1195_v50, %v244_v1  ;;  %903 = vmatprep.mubr.f32.mxu0 %v385_v62  ;;  %v388_v5 = vmax.f32 %v250_v0, 0.0 }
  0xd2   :  { %v831_v3 = vpop.f32.mrf.mxu0  ;;  %904 = vmatmul.mubr.f32.gmra.mxu0 %v386_v63 }
  0xd3   :  { %v387_v4 = vmax.f32 %v245_v2, 0.0  ;;  %v260_v6 = vadd.f32 %v831_v3, %v1195_v50 }
  0xd4   :  { %v254_v7 = vpop.f32.mrf.mxu0 }
  0xd5   :  { %906 = vmatprep.mubr.f32.mxu0 %v387_v4  ;;  %v255_v8 = vadd.f32 %v1195_v50, %v254_v7  ;;  %v390_v11 = vmax.f32 %v260_v6, 0.0 }
  0xd6   :  { %v834_v9 = vpop.f32.mrf.mxu0  ;;  %907 = vmatmul.mubr.f32.gmra.mxu0 %v388_v5 }
  0xd7   :  { %v389_v10 = vmax.f32 %v255_v8, 0.0  ;;  %v270_v12 = vadd.f32 %v834_v9, %v1195_v50 }
  0xd8   :  { %v264_v13 = vpop.f32.mrf.mxu0 }
  0xd9   :  { %v265_v14 = vadd.f32 %v1195_v50, %v264_v13  ;;  %909 = vmatprep.mubr.f32.mxu1 %v389_v10  ;;  %v392_v17 = vmax.f32 %v270_v12, 0.0 }
  0xda   :  { %v837_v15 = vpop.f32.mrf.mxu0  ;;  %910 = vmatmul.mubr.f32.vlgmr.msra.gmra.mxu1 %v390_v11 }
  0xdb   :  { %v391_v16 = vmax.f32 %v265_v14, 0.0  ;;  %v280_v18 = vadd.f32 %v837_v15, %v1195_v50 }
  0xdc   :  { %v274_v19 = vpop.f32.mrf.mxu0 }
  0xdd   :  { %v275_v20 = vadd.f32 %v1195_v50, %v274_v19  ;;  %912 = vmatprep.mubr.f32.mxu1 %v391_v16  ;;  %v394_v23 = vmax.f32 %v280_v18, 0.0 }
  0xde   :  { %v840_v21 = vpop.f32.mrf.mxu0  ;;  %913 = vmatmul.mubr.f32.gmra.mxu1 %v392_v17 }
  0xdf   :  { %v393_v22 = vmax.f32 %v275_v20, 0.0  ;;  %v290_v24 = vadd.f32 %v840_v21, %v1195_v50  ;;  %v1232_v20 = vld [vmem:[%s1398_s4] ss:$0 sm:$0xff] }
  0xe0   :  { %v284_v25 = vpop.f32.mrf.mxu0 }
  0xe1   :  { %v285_v26 = vadd.f32 %v1195_v50, %v284_v25  ;;  %915 = vmatprep.mubr.f32.mxu1 %v393_v22  ;;  %v396_v29 = vmax.f32 %v290_v24, 0.0 }
  0xe2   :  { %v843_v27 = vpop.f32.mrf.mxu0  ;;  %916 = vmatmul.mubr.f32.gmra.mxu1 %v394_v23 }
  0xe3   :  { %v395_v28 = vmax.f32 %v285_v26, 0.0  ;;  %v300_v30 = vadd.f32 %v843_v27, %v1195_v50 }
  0xe4   :  { %v294_v31 = vpop.f32.mrf.mxu0 }
  0xe5   :  { %v295_v32 = vadd.f32 %v1195_v50, %v294_v31  ;;  %918 = vmatprep.mubr.f32.mxu1 %v395_v28  ;;  %v398_v35 = vmax.f32 %v300_v30, 0.0 }
  0xe6   :  { %v846_v33 = vpop.f32.mrf.mxu0  ;;  %919 = vmatmul.mubr.f32.gmra.mxu1 %v396_v29 }
  0xe7   :  { %v397_v34 = vmax.f32 %v295_v32, 0.0  ;;  %v310_v36 = vadd.f32 %v846_v33, %v1195_v50 }
  0xe8   :  { %v304_v37 = vpop.f32.mrf.mxu0 }
  0xe9   :  { %v305_v38 = vadd.f32 %v1195_v50, %v304_v37  ;;  %921 = vmatprep.mubr.f32.mxu1 %v397_v34  ;;  %v400_v41 = vmax.f32 %v310_v36, 0.0 }
  0xea   :  { %v849_v39 = vpop.f32.mrf.mxu0  ;;  %922 = vmatmul.mubr.f32.gmra.mxu1 %v398_v35 }
  0xeb   :  { %v399_v40 = vmax.f32 %v305_v38, 0.0  ;;  %v320_v42 = vadd.f32 %v849_v39, %v1195_v50 }
  0xec   :  { %v314_v43 = vpop.f32.mrf.mxu0 }
  0xed   :  { %v315_v44 = vadd.f32 %v1195_v50, %v314_v43  ;;  %924 = vmatprep.mubr.f32.mxu1 %v399_v40  ;;  %v402_v47 = vmax.f32 %v320_v42, 0.0 }
  0xee   :  { %v852_v45 = vpop.f32.mrf.mxu0  ;;  %925 = vmatmul.mubr.f32.gmra.mxu1 %v400_v41 }
  0xef   :  { %v401_v46 = vmax.f32 %v315_v44, 0.0  ;;  %v330_v48 = vadd.f32 %v852_v45, %v1195_v50 }
  0xf0   :  { %v324_v49 = vpop.f32.mrf.mxu0 }
  0xf1   :  { %v325_v51 = vadd.f32 %v1195_v50, %v324_v49  ;;  %927 = vmatprep.mubr.f32.mxu1 %v401_v46  ;;  %v404_v54 = vmax.f32 %v330_v48, 0.0 }
  0xf2   :  { %v855_v52 = vpop.f32.mrf.mxu0  ;;  %928 = vmatmul.mubr.f32.gmra.mxu1 %v402_v47 }
  0xf3   :  { %v403_v53 = vmax.f32 %v325_v51, 0.0  ;;  %v340_v55 = vadd.f32 %v855_v52, %v1195_v50 }
  0xf4   :  { %v334_v56 = vpop.f32.mrf.mxu0 }
  0xf5   :  { %v335_v57 = vadd.f32 %v1195_v50, %v334_v56  ;;  %930 = vmatprep.mubr.f32.mxu1 %v403_v53  ;;  %v406_v60 = vmax.f32 %v340_v55, 0.0 }
  0xf6   :  { %v858_v58 = vpop.f32.mrf.mxu0  ;;  %931 = vmatmul.mubr.f32.gmra.mxu1 %v404_v54 }
  0xf7   :  { %v405_v59 = vmax.f32 %v335_v57, 0.0  ;;  %v350_v61 = vadd.f32 %v858_v58, %v1195_v50 }
  0xf8   :  { %v344_v62 = vpop.f32.mrf.mxu0 }
  0xf9   :  { %v345_v63 = vadd.f32 %v1195_v50, %v344_v62  ;;  %933 = vmatprep.mubr.f32.mxu1 %v405_v59  ;;  %v408_v2 = vmax.f32 %v350_v61, 0.0 }
  0xfa   :  { %v861_v0 = vpop.f32.mrf.mxu0  ;;  %934 = vmatmul.mubr.f32.gmra.mxu1 %v406_v60 }
  0xfb   :  { %v407_v1 = vmax.f32 %v345_v63, 0.0  ;;  %v360_v3 = vadd.f32 %v861_v0, %v1195_v50 }
  0xfc   :  { %v354_v4 = vpop.f32.mrf.mxu0 }
  0xfd   :  { %v355_v5 = vadd.f32 %v1195_v50, %v354_v4  ;;  %936 = vmatprep.mubr.f32.mxu1 %v407_v1  ;;  %v410_v8 = vmax.f32 %v360_v3, 0.0 }
  0xfe   :  { %v864_v6 = vpop.f32.mrf.mxu0  ;;  %937 = vmatmul.mubr.f32.gmra.mxu1 %v408_v2 }
  0xff   :  { %v409_v7 = vmax.f32 %v355_v5, 0.0  ;;  %v370_v9 = vadd.f32 %v864_v6, %v1195_v50 }
 0x100   :  { %v364_v10 = vpop.f32.mrf.mxu0 }
 0x101   :  { %v365_v11 = vadd.f32 %v1195_v50, %v364_v10  ;;  %939 = vmatprep.mubr.f32.mxu1 %v409_v7  ;;  %v412_v14 = vmax.f32 %v370_v9, 0.0 }
 0x102   :  { %v867_v12 = vpop.f32.mrf.mxu0  ;;  %940 = vmatmul.mubr.f32.gmra.mxu1 %v410_v8 }
 0x103   :  { %v411_v13 = vmax.f32 %v365_v11, 0.0  ;;  %v380_v15 = vadd.f32 %v867_v12, %v1195_v50 }
 0x104   :  { %v374_v16 = vpop.f32.mrf.mxu0 }
 0x105   :  { %v375_v17 = vadd.f32 %v1195_v50, %v374_v16  ;;  %942 = vmatprep.mubr.f32.mxu1 %v411_v13  ;;  %v414_v19 = vmax.f32 %v380_v15, 0.0 }
 0x106   :  { %943 = vmatmul.mubr.f32.gmra.mxu1 %v412_v14 }
 0x107   :  { %v413_v18 = vmax.f32 %v375_v17, 0.0 }
 0x109   :  { %945 = vmatprep.mubr.f32.mxu1 %v413_v18 }
 0x10a   :  { %946 = vmatmul.mubr.f32.gmra.mxu1 %v414_v19 }
 0x18e   :  { %v902_v21 = vpop.f32.mrf.mxu0 }
 0x18f   :  { %v510_v22 = vadd.f32 %v902_v21, %v1232_v20 }
 0x190   :  { %v504_v23 = vpop.f32.mrf.mxu0 }
 0x191   :  { %665 = vst.msk [vmem:[%s1399_s5 + $0x8] sm:$0xff] %vm663_vm1, %v510_v22  ;;  %v505_v50 = vadd.f32 %v1232_v20, %v504_v23 }
 0x192   :  { %v905_v24 = vpop.f32.mrf.mxu0 }
 0x193   :  { %664 = vst.msk [vmem:[%s1399_s5] sm:$0xff] %vm663_vm1, %v505_v50  ;;  %v520_v25 = vadd.f32 %v905_v24, %v1232_v20 }
 0x194   :  { %v514_v26 = vpop.f32.mrf.mxu0 }
 0x195   :  { %667 = vst.msk [vmem:[%s1399_s5 + $0x18] sm:$0xff] %vm663_vm1, %v520_v25  ;;  %v515_v27 = vadd.f32 %v1232_v20, %v514_v26 }
 0x196   :  { %v908_v28 = vpop.f32.mrf.mxu0 }
 0x197   :  { %666 = vst.msk [vmem:[%s1399_s5 + $0x10] sm:$0xff] %vm663_vm1, %v515_v27  ;;  %v530_v29 = vadd.f32 %v908_v28, %v1232_v20 }
 0x198   :  { %v524_v30 = vpop.f32.mrf.mxu0 }
 0x199   :  { %669 = vst.msk [vmem:[%s1399_s5 + $0x28] sm:$0xff] %vm663_vm1, %v530_v29  ;;  %v525_v31 = vadd.f32 %v1232_v20, %v524_v30 }
 0x19a   :  { %v911_v32 = vpop.f32.mrf.mxu1 }
 0x19b   :  { %668 = vst.msk [vmem:[%s1399_s5 + $0x20] sm:$0xff] %vm663_vm1, %v525_v31  ;;  %v540_v33 = vadd.f32 %v911_v32, %v1232_v20 }
 0x19c   :  { %v534_v34 = vpop.f32.mrf.mxu1 }
 0x19d   :  { %671 = vst.msk [vmem:[%s1399_s5 + $0x38] sm:$0xff] %vm663_vm1, %v540_v33  ;;  %v535_v35 = vadd.f32 %v1232_v20, %v534_v34 }
 0x19e   :  { %v914_v36 = vpop.f32.mrf.mxu1 }
 0x19f   :  { %670 = vst.msk [vmem:[%s1399_s5 + $0x30] sm:$0xff] %vm663_vm1, %v535_v35  ;;  %v550_v37 = vadd.f32 %v914_v36, %v1232_v20 }
 0x1a0   :  { %v544_v38 = vpop.f32.mrf.mxu1 }
 0x1a1   :  { %673 = vst.msk [vmem:[%s1399_s5 + $0x48] sm:$0xff] %vm663_vm1, %v550_v37  ;;  %v545_v39 = vadd.f32 %v1232_v20, %v544_v38 }
 0x1a2   :  { %v917_v40 = vpop.f32.mrf.mxu1 }
 0x1a3   :  { %672 = vst.msk [vmem:[%s1399_s5 + $0x40] sm:$0xff] %vm663_vm1, %v545_v39  ;;  %v560_v41 = vadd.f32 %v917_v40, %v1232_v20 }
 0x1a4   :  { %v554_v42 = vpop.f32.mrf.mxu1 }
 0x1a5   :  { %675 = vst.msk [vmem:[%s1399_s5 + $0x58] sm:$0xff] %vm663_vm1, %v560_v41  ;;  %v555_v43 = vadd.f32 %v1232_v20, %v554_v42 }
 0x1a6   :  { %v920_v44 = vpop.f32.mrf.mxu1 }
 0x1a7   :  { %674 = vst.msk [vmem:[%s1399_s5 + $0x50] sm:$0xff] %vm663_vm1, %v555_v43  ;;  %v570_v45 = vadd.f32 %v920_v44, %v1232_v20 }
 0x1a8   :  { %v564_v46 = vpop.f32.mrf.mxu1 }
 0x1a9   :  { %677 = vst.msk [vmem:[%s1399_s5 + $0x68] sm:$0xff] %vm663_vm1, %v570_v45  ;;  %v565_v47 = vadd.f32 %v1232_v20, %v564_v46 }
 0x1aa   :  { %v923_v48 = vpop.f32.mrf.mxu1 }
 0x1ab   :  { %676 = vst.msk [vmem:[%s1399_s5 + $0x60] sm:$0xff] %vm663_vm1, %v565_v47  ;;  %v580_v49 = vadd.f32 %v923_v48, %v1232_v20 }
 0x1ac   :  { %v574_v51 = vpop.f32.mrf.mxu1 }
 0x1ad   :  { %679 = vst.msk [vmem:[%s1399_s5 + $0x78] sm:$0xff] %vm663_vm1, %v580_v49  ;;  %v575_v52 = vadd.f32 %v1232_v20, %v574_v51 }
 0x1ae   :  { %v926_v53 = vpop.f32.mrf.mxu1 }
 0x1af   :  { %678 = vst.msk [vmem:[%s1399_s5 + $0x70] sm:$0xff] %vm663_vm1, %v575_v52  ;;  %v590_v54 = vadd.f32 %v926_v53, %v1232_v20 }
 0x1b0   :  { %v584_v55 = vpop.f32.mrf.mxu1 }
 0x1b1   :  { %681 = vst.msk [vmem:[%s1399_s5 + $0x88] sm:$0xff] %vm663_vm1, %v590_v54  ;;  %v585_v56 = vadd.f32 %v1232_v20, %v584_v55 }
 0x1b2   :  { %v929_v57 = vpop.f32.mrf.mxu1 }
 0x1b3   :  { %680 = vst.msk [vmem:[%s1399_s5 + $0x80] sm:$0xff] %vm663_vm1, %v585_v56  ;;  %v600_v58 = vadd.f32 %v929_v57, %v1232_v20 }
 0x1b4   :  { %v594_v59 = vpop.f32.mrf.mxu1 }
 0x1b5   :  { %683 = vst.msk [vmem:[%s1399_s5 + $0x98] sm:$0xff] %vm663_vm1, %v600_v58  ;;  %v595_v60 = vadd.f32 %v1232_v20, %v594_v59 }
 0x1b6   :  { %v932_v61 = vpop.f32.mrf.mxu1 }
 0x1b7   :  { %682 = vst.msk [vmem:[%s1399_s5 + $0x90] sm:$0xff] %vm663_vm1, %v595_v60  ;;  %v610_v62 = vadd.f32 %v932_v61, %v1232_v20 }
 0x1b8   :  { %v604_v63 = vpop.f32.mrf.mxu1 }
 0x1b9   :  { %685 = vst.msk [vmem:[%s1399_s5 + $0xa8] sm:$0xff] %vm663_vm1, %v610_v62  ;;  %v605_v0 = vadd.f32 %v1232_v20, %v604_v63 }
 0x1ba   :  { %v935_v1 = vpop.f32.mrf.mxu1 }
 0x1bb   :  { %684 = vst.msk [vmem:[%s1399_s5 + $0xa0] sm:$0xff] %vm663_vm1, %v605_v0  ;;  %v620_v2 = vadd.f32 %v935_v1, %v1232_v20 }
 0x1bc   :  { %v614_v3 = vpop.f32.mrf.mxu1 }
 0x1bd   :  { %687 = vst.msk [vmem:[%s1399_s5 + $0xb8] sm:$0xff] %vm663_vm1, %v620_v2  ;;  %v615_v4 = vadd.f32 %v1232_v20, %v614_v3 }
 0x1be   :  { %v938_v5 = vpop.f32.mrf.mxu1 }
 0x1bf   :  { %686 = vst.msk [vmem:[%s1399_s5 + $0xb0] sm:$0xff] %vm663_vm1, %v615_v4  ;;  %v630_v6 = vadd.f32 %v938_v5, %v1232_v20 }
 0x1c0   :  { %v624_v7 = vpop.f32.mrf.mxu1 }
 0x1c1   :  { %689 = vst.msk [vmem:[%s1399_s5 + $0xc8] sm:$0xff] %vm663_vm1, %v630_v6  ;;  %v625_v8 = vadd.f32 %v1232_v20, %v624_v7 }
 0x1c2   :  { %v941_v9 = vpop.f32.mrf.mxu1 }
 0x1c3   :  { %688 = vst.msk [vmem:[%s1399_s5 + $0xc0] sm:$0xff] %vm663_vm1, %v625_v8  ;;  %v640_v10 = vadd.f32 %v941_v9, %v1232_v20 }
 0x1c4   :  { %v634_v11 = vpop.f32.mrf.mxu1 }
 0x1c5   :  { %691 = vst.msk [vmem:[%s1399_s5 + $0xd8] sm:$0xff] %vm663_vm1, %v640_v10  ;;  %v635_v12 = vadd.f32 %v1232_v20, %v634_v11 }
 0x1c6   :  { %v944_v13 = vpop.f32.mrf.mxu1 }
 0x1c7   :  { %690 = vst.msk [vmem:[%s1399_s5 + $0xd0] sm:$0xff] %vm663_vm1, %v635_v12  ;;  %v650_v14 = vadd.f32 %v944_v13, %v1232_v20 }
 0x1c8   :  { %v644_v15 = vpop.f32.mrf.mxu1 }
 0x1c9   :  { %693 = vst.msk [vmem:[%s1399_s5 + $0xe8] sm:$0xff] %vm663_vm1, %v650_v14  ;;  %v645_v16 = vadd.f32 %v1232_v20, %v644_v15 }
 0x1ca   :  { %v947_v17 = vpop.f32.mrf.mxu1 }
 0x1cb   :  { %692 = vst.msk [vmem:[%s1399_s5 + $0xe0] sm:$0xff] %vm663_vm1, %v645_v16  ;;  %v660_v18 = vadd.f32 %v947_v17, %v1232_v20 }
 0x1cc   :  { %v654_v19 = vpop.f32.mrf.mxu1 }
 0x1cd   :  { %695 = vst.msk [vmem:[%s1399_s5 + $0xf8] sm:$0xff] %vm663_vm1, %v660_v18  ;;  %v655_v21 = vadd.f32 %v1232_v20, %v654_v19 }
 0x1cf   :  { %694 = vst.msk [vmem:[%s1399_s5 + $0xf0] sm:$0xff] %vm663_vm1, %v655_v21 }

</bundles_post_ra>
